<compile_context>
chip_gen: v6e
topology: v6e:2x2x1
jax: 0.10.0
libtpu: 0.0.40
codegen_flags: <defaults>
</compile_context>

<pallas_src>
import jax
import jax.numpy as jnp
from jax.experimental import pallas as pl
from jax.experimental.pallas import tpu as pltpu

EPSILON = 1e-05
LANE = 128


def _device_kind() -> str:
    try:
        return jax.devices()[0].device_kind.lower()
    except Exception:
        return ""


def _vmem_budget():
    """(streamed-block byte budget, vmem_limit_bytes or None) per TPU generation."""
    kind = _device_kind()
    if "v7" in kind:
        # 64 MiB physical VMEM, 3.2 TB/s HBM: bigger blocks amortize the
        # ~0.35 us per-grid-step tax; keep headroom for f32 intermediates.
        return 20 * 1024 * 1024, 48 * 1024 * 1024
    if "v6" in kind or "trillium" in kind:
        # 128 MiB physical VMEM: raise the scoped limit and stream larger blocks.
        return 20 * 1024 * 1024, 64 * 1024 * 1024
    # v5e / unknown: stay comfortably under the 16 MiB default scoped VMEM.
    return 8 * 1024 * 1024, None


def _num_tc_splits() -> int:
    """Chips with 2 TensorCores get a leading 'parallel' grid axis."""
    kind = _device_kind()
    if "v7" in kind or "v4" in kind or "v5p" in kind:
        return 2
    return 1


def _sublane_multiple(dtype) -> int:
    # f32 -> 8, bf16 -> 16, int8/bool -> 32 (sub-32-bit dtypes pack along sublanes).
    return max(8, 32 // jnp.dtype(dtype).itemsize)


def _choose_tile(full: int, mult: int, cap: int) -> int:
    """Largest extent that is a multiple of `mult` and <= min(full, cap), or the
    full dim itself when it is small (blocks equal to the array dim are legal)."""
    if full <= mult:
        return full
    tile = min(max(cap, mult), full)
    return max((tile // mult) * mult, mult)


def _make_dice_kernel(tile: int, valid: int, blocks_per_split: int, needs_mask: bool):
    """Accumulate per-row intersection / union partial sums over streamed blocks.

    Block layouts handled:
      dense : (N, tile, 128)  -- flattened features packed as (S, 128)
      ragged: (N, tile)       -- features kept on the lane axis only
    In both, the streamed axis is block axis 1 with logical extent `valid`;
    out-of-range rows/lanes (partial or clamped blocks) are masked to zero
    AFTER the sigmoid so they contribute to neither sum.
    """

    def kernel(pre_ref, tar_ref, inter_ref, union_ref):
        k = pl.program_id(1)

        @pl.when(k == 0)
        def _init():
            inter_ref[...] = jnp.zeros_like(inter_ref)
            union_ref[...] = jnp.zeros_like(union_ref)

        g = pl.program_id(0) * blocks_per_split + k   # global block index
        start = g * tile                              # global offset on streamed axis

        def accumulate(masked):
            # Upcast to f32 in-kernel (inputs may be bf16 / int8 / bool to cut
            # HBM bytes); all math stays f32 on every TPU generation.
            p = jax.nn.sigmoid(pre_ref[...].astype(jnp.float32))
            t = tar_ref[...].astype(jnp.float32)
            if masked:
                idx = jax.lax.broadcasted_iota(jnp.int32, p.shape, 1) + start
                m = idx < valid
                p = jnp.where(m, p, 0.0)
                t = jnp.where(m, t, 0.0)
            if p.ndim == 3:          # dense (N, tile, 128): reduce the sublane axis
                inter_inc = jnp.sum(p * t, axis=1)
                union_inc = jnp.sum(p, axis=1) + jnp.sum(t, axis=1)
            else:                    # ragged (N, tile): pure elementwise accumulate
                inter_inc = p * t
                union_inc = p + t
            inter_ref[...] += inter_inc[None]
            union_ref[...] += union_inc[None]

        if not needs_mask:
            accumulate(False)
        else:
            is_partial = (start + tile) > valid

            @pl.when(jnp.logical_not(is_partial))
            def _interior():
                accumulate(False)

            @pl.when(is_partial)
            def _tail():
                accumulate(True)

    return kernel


def dice_loss(predict, target):
    """Pallas TPU implementation of DiceLoss.forward; returns a float32 scalar.

    predict / target: same shape, leading dim = batch N.  Narrow dtypes
    (bf16 predict, bf16/int8/bool target) are accepted and upcast in-kernel.
    """
    assert predict.shape == target.shape, (
        "the size of predict and target must be equal.")
    N = predict.shape[0]
    D = 1
    for d in predict.shape[1:]:
        D *= int(d)
    D = max(D, 1)
    pre2d = predict.reshape(N, D)
    tar2d = target.reshape(N, D)

    budget, vmem_limit = _vmem_budget()
    splits = _num_tc_splits()
    in_bytes = pre2d.dtype.itemsize + tar2d.dtype.itemsize

    if D % LANE == 0:
        # Dense packing: features occupy (sublane, lane) = (S, 128) so vregs are
        # dense even for tiny N.  Free reshape, no pad, no copy.
        S = D // LANE
        sub_mult = max(_sublane_multiple(pre2d.dtype),
                       _sublane_multiple(tar2d.dtype))
        per_elem = 2 * in_bytes + 3 * 4          # dbl-buffered inputs + f32 temps
        cap = max((budget // per_elem) // (N * LANE), 1)
        tile = _choose_tile(S, sub_mult, cap)
        valid, view, block, acc_c = S, (N, S, LANE), (N, tile, LANE), LANE

        def in_map_factory(bps, last):
            return lambda c, k: (0, jnp.minimum(c * bps + k, last), 0)
    else:
        # Ragged D: keep (N, D) and tile the lane axis; the partial tail block is
        # masked in-kernel instead of materializing a padded HBM copy.
        per_elem = 2 * in_bytes + 3 * 4 + 4 * 4  # + double-buffered f32 partials
        cap = max((budget // per_elem) // N, LANE)
        tile = _choose_tile(D, LANE, cap)
        valid, view, block, acc_c = D, (N, D), (N, tile), tile

        def in_map_factory(bps, last):
            return lambda c, k: (0, jnp.minimum(c * bps + k, last))

    pre_v = pre2d.reshape(view)
    tar_v = tar2d.reshape(view)

    num_blocks = -(-valid // tile)
    splits = max(1, min(splits, num_blocks))
    blocks_per_split = -(-num_blocks // splits)
    needs_mask = (splits * blocks_per_split * tile) != valid
    in_map = in_map_factory(blocks_per_split, num_blocks - 1)

    kernel = _make_dice_kernel(tile, valid, blocks_per_split, needs_mask)

    cp_kwargs = dict(dimension_semantics=("parallel", "arbitrary"))
    if vmem_limit is not None:
        cp_kwargs["vmem_limit_bytes"] = int(vmem_limit)

    part_shape = jax.ShapeDtypeStruct((splits, N, acc_c), jnp.float32)
    out_spec = pl.BlockSpec((1, N, acc_c), lambda c, k: (c, 0, 0))

    inter_parts, union_parts = pl.pallas_call(
        kernel,
        out_shape=(part_shape, part_shape),
        grid=(splits, blocks_per_split),
        in_specs=[pl.BlockSpec(block, in_map), pl.BlockSpec(block, in_map)],
        out_specs=(out_spec, out_spec),
        compiler_params=pltpu.CompilerParams(**cp_kwargs),
    )(pre_v, tar_v)

    # Tiny plain-JAX epilogue: cross-lane / cross-core reduce + dice score.
    inter = inter_parts.sum(axis=(0, 2))      # (N,)
    union = union_parts.sum(axis=(0, 2))      # (N,)
    dice = jnp.mean(2.0 * (inter + EPSILON) / (union + EPSILON))
    return (1.0 - dice).astype(jnp.float32)


def _dice_loss_ref(predict, target):
    # Pure-JAX reference for a sanity check.
    N = predict.shape[0]
    p = jax.nn.sigmoid(predict.astype(jnp.float32)).reshape(N, -1)
    t = target.astype(jnp.float32).reshape(N, -1)
    inter = (p * t).sum(-1)
    union = (p + t).sum(-1)
    dice = jnp.mean(2.0 * (inter + EPSILON) / (union + EPSILON))
    return 1.0 - dice


if __name__ == "__main__":
    key = jax.random.PRNGKey(0)
    k1, k2, k3, k4, k5, k6 = jax.random.split(key, 6)

    # 1) NCHW float32, lane-aligned D (= 4*16*16 = 1024) -> dense (S,128) path.
    predict = jax.random.normal(k1, (2, 4, 16, 16), dtype=jnp.float32)
    target = (jax.random.uniform(k2, (2, 4, 16, 16)) > 0.5).astype(jnp.float32)
    score = jax.block_until_ready(dice_loss(predict, target))
    ref = jax.block_until_ready(_dice_loss_ref(predict, target))
    assert jnp.allclose(score, ref, atol=1e-5, rtol=1e-5), (score, ref)

    # 2) Ragged D (3*17*13 = 663): no host-side pad, tail masked in-kernel.
    predict2 = jax.random.normal(k3, (2, 3, 17, 13), dtype=jnp.float32)
    target2 = (jax.random.uniform(k4, (2, 3, 17, 13)) > 0.5).astype(jnp.float32)
    score2 = jax.block_until_ready(dice_loss(predict2, target2))
    ref2 = jax.block_until_ready(_dice_loss_ref(predict2, target2))
    assert jnp.allclose(score2, ref2, atol=1e-5, rtol=1e-5), (score2, ref2)

    # 3) Narrow-dtype inputs (bf16): half the HBM traffic; kernel upcasts to f32.
    predict3 = jax.random.normal(k5, (2, 4, 16, 16), dtype=jnp.bfloat16)
    target3 = (jax.random.uniform(k6, (2, 4, 16, 16)) > 0.5).astype(jnp.bfloat16)
    score3 = jax.block_until_ready(dice_loss(predict3, target3))
    ref3 = jax.block_until_ready(_dice_loss_ref(predict3, target3))
    assert jnp.allclose(score3, ref3, atol=1e-4, rtol=1e-4), (score3, ref3)

    print("KERNEL_OK")
</pallas_src>

<mosaic_0001>
module attributes {stable_mosaic.version = 11 : i64} {
  func.func @kernel(%arg0: i32, %arg1: i32, %arg2: memref<2x8x128xf32, #tpu.memory_space<vmem>>, %arg3: memref<2x8x128xf32, #tpu.memory_space<vmem>>, %arg4: memref<1x2x128xf32, #tpu.memory_space<vmem>>, %arg5: memref<1x2x128xf32, #tpu.memory_space<vmem>>) attributes {dimension_semantics = [#tpu.dimension_semantics<parallel>, #tpu.dimension_semantics<arbitrary>], iteration_bounds = array<i64: 1, 1>, scalar_prefetch = 0 : i64, scratch_operands = 0 : i64, tpu.core_type = #tpu.core_type<tc>, window_params = [{transform_indices = @transform_0, window_bounds = array<i64: 2, 8, 128>}, {transform_indices = @transform_1, window_bounds = array<i64: 2, 8, 128>}, {transform_indices = @transform_2, window_bounds = array<i64: 1, 2, 128>}, {transform_indices = @transform_3, window_bounds = array<i64: 1, 2, 128>}]} {
    %c0_i32 = arith.constant 0 : i32
    %0 = arith.cmpi eq, %arg1, %c0_i32 : i32
    %1 = arith.extui %0 : i1 to i32
    %c0_i32_0 = arith.constant 0 : i32
    %2 = arith.cmpi ne, %1, %c0_i32_0 : i32
    scf.if %2 {
      %cst_21 = arith.constant 0.000000e+00 : f32
      %23 = vector.broadcast %cst_21 : f32 to vector<1x2x128xf32>
      %c0_22 = arith.constant 0 : index
      %c0_23 = arith.constant 0 : index
      %c0_24 = arith.constant 0 : index
      %24 = vector.load %arg4[%c0_22, %c0_23, %c0_24] : memref<1x2x128xf32, #tpu.memory_space<vmem>>, vector<1x2x128xf32>
      tpu.vector_store %arg4[%c0_22, %c0_23, %c0_24], %23 {strides = array<i32>} : memref<1x2x128xf32, #tpu.memory_space<vmem>>, vector<1x2x128xf32>,
      %cst_25 = arith.constant 0.000000e+00 : f32
      %25 = vector.broadcast %cst_25 : f32 to vector<1x2x128xf32>
      %c0_26 = arith.constant 0 : index
      %c0_27 = arith.constant 0 : index
      %c0_28 = arith.constant 0 : index
      %26 = vector.load %arg5[%c0_26, %c0_27, %c0_28] : memref<1x2x128xf32, #tpu.memory_space<vmem>>, vector<1x2x128xf32>
      tpu.vector_store %arg5[%c0_26, %c0_27, %c0_28], %25 {strides = array<i32>} : memref<1x2x128xf32, #tpu.memory_space<vmem>>, vector<1x2x128xf32>,
    } else {
    }
    %c0 = arith.constant 0 : index
    %c0_1 = arith.constant 0 : index
    %c0_2 = arith.constant 0 : index
    %3 = vector.load %arg2[%c0, %c0_1, %c0_2] : memref<2x8x128xf32, #tpu.memory_space<vmem>>, vector<2x8x128xf32>
    %4 = arith.negf %3 : vector<2x8x128xf32>
    %5 = math.exp %4 : vector<2x8x128xf32>
    %cst = arith.constant 1.000000e+00 : f32
    %6 = vector.broadcast %cst : f32 to vector<2x8x128xf32>
    %7 = arith.addf %6, %5 : vector<2x8x128xf32>
    %8 = arith.divf %6, %7 : vector<2x8x128xf32>
    %c0_3 = arith.constant 0 : index
    %c0_4 = arith.constant 0 : index
    %c0_5 = arith.constant 0 : index
    %9 = vector.load %arg3[%c0_3, %c0_4, %c0_5] : memref<2x8x128xf32, #tpu.memory_space<vmem>>, vector<2x8x128xf32>
    %10 = arith.mulf %8, %9 : vector<2x8x128xf32>
    %cst_6 = arith.constant dense<0.000000e+00> : vector<2x128xf32>
    %11 = vector.multi_reduction <add>, %10, %cst_6 [1] : vector<2x8x128xf32> to vector<2x128xf32>
    %cst_7 = arith.constant dense<0.000000e+00> : vector<2x128xf32>
    %12 = vector.multi_reduction <add>, %8, %cst_7 [1] : vector<2x8x128xf32> to vector<2x128xf32>
    %cst_8 = arith.constant dense<0.000000e+00> : vector<2x128xf32>
    %13 = vector.multi_reduction <add>, %9, %cst_8 [1] : vector<2x8x128xf32> to vector<2x128xf32>
    %14 = arith.addf %12, %13 : vector<2x128xf32>
    %c0_9 = arith.constant 0 : index
    %c0_10 = arith.constant 0 : index
    %c0_11 = arith.constant 0 : index
    %15 = vector.load %arg4[%c0_9, %c0_10, %c0_11] : memref<1x2x128xf32, #tpu.memory_space<vmem>>, vector<1x2x128xf32>
    %16 = vector.shape_cast %11 : vector<2x128xf32> to vector<1x2x128xf32>
    %17 = arith.addf %15, %16 : vector<1x2x128xf32>
    %c0_12 = arith.constant 0 : index
    %c0_13 = arith.constant 0 : index
    %c0_14 = arith.constant 0 : index
    %18 = vector.load %arg4[%c0_12, %c0_13, %c0_14] : memref<1x2x128xf32, #tpu.memory_space<vmem>>, vector<1x2x128xf32>
    tpu.vector_store %arg4[%c0_12, %c0_13, %c0_14], %17 {strides = array<i32>} : memref<1x2x128xf32, #tpu.memory_space<vmem>>, vector<1x2x128xf32>,
    %c0_15 = arith.constant 0 : index
    %c0_16 = arith.constant 0 : index
    %c0_17 = arith.constant 0 : index
    %19 = vector.load %arg5[%c0_15, %c0_16, %c0_17] : memref<1x2x128xf32, #tpu.memory_space<vmem>>, vector<1x2x128xf32>
    %20 = vector.shape_cast %14 : vector<2x128xf32> to vector<1x2x128xf32>
    %21 = arith.addf %19, %20 : vector<1x2x128xf32>
    %c0_18 = arith.constant 0 : index
    %c0_19 = arith.constant 0 : index
    %c0_20 = arith.constant 0 : index
    %22 = vector.load %arg5[%c0_18, %c0_19, %c0_20] : memref<1x2x128xf32, #tpu.memory_space<vmem>>, vector<1x2x128xf32>
    tpu.vector_store %arg5[%c0_18, %c0_19, %c0_20], %21 {strides = array<i32>} : memref<1x2x128xf32, #tpu.memory_space<vmem>>, vector<1x2x128xf32>,
    return
  }
  func.func @transform_0(%arg0: i32, %arg1: i32) -> (i32, i32, i32) {
    %c1_i32 = arith.constant 1 : i32
    %0 = arith.muli %arg0, %c1_i32 : i32
    %1 = arith.addi %0, %arg1 : i32
    %c0_i32 = arith.constant 0 : i32
    %2 = arith.minsi %1, %c0_i32 : i32
    %c0_i32_0 = arith.constant 0 : i32
    %c0_i32_1 = arith.constant 0 : i32
    %c0_i32_2 = arith.constant 0 : i32
    return %c0_i32_0, %2, %c0_i32_1 : i32, i32, i32
  }
  func.func @transform_1(%arg0: i32, %arg1: i32) -> (i32, i32, i32) {
    %c1_i32 = arith.constant 1 : i32
    %0 = arith.muli %arg0, %c1_i32 : i32
    %1 = arith.addi %0, %arg1 : i32
    %c0_i32 = arith.constant 0 : i32
    %2 = arith.minsi %1, %c0_i32 : i32
    %c0_i32_0 = arith.constant 0 : i32
    %c0_i32_1 = arith.constant 0 : i32
    %c0_i32_2 = arith.constant 0 : i32
    return %c0_i32_0, %2, %c0_i32_1 : i32, i32, i32
  }
  func.func @transform_2(%arg0: i32, %arg1: i32) -> (i32, i32, i32) {
    %c0_i32 = arith.constant 0 : i32
    %c0_i32_0 = arith.constant 0 : i32
    %c0_i32_1 = arith.constant 0 : i32
    return %arg0, %c0_i32, %c0_i32_0 : i32, i32, i32
  }
  func.func @transform_3(%arg0: i32, %arg1: i32) -> (i32, i32, i32) {
    %c0_i32 = arith.constant 0 : i32
    %c0_i32_0 = arith.constant 0 : i32
    %c0_i32_1 = arith.constant 0 : i32
    return %arg0, %c0_i32, %c0_i32_0 : i32, i32, i32
  }
}

</mosaic_0001>

<bundles_post_ra>
// kernel: tpu_custom_call.1
= control target key start
LH: loop header
LB: loop body
LE: loop exit
PB: predicated region body
PF: predicated region fallthrough
CT: control target
= control target key end

     0   :  { %9 = vsyncpa [#allocation3], 0  ;;  %s314_s0 = inlined_call_operand.hbm [shape: f32[2,8,128], index: 0, kind: input, shape index: {}]   ;;  %s315_s1 = inlined_call_operand.hbm [shape: f32[2,8,128], index: 1, kind: input, shape index: {}]   ;;  %s316_s2 = inlined_call_operand.hbm [shape: f32[1,2,128], index: 2, kind: output, shape index: {0}]   ;;  %s317_s3 = inlined_call_operand.hbm [shape: f32[1,2,128], index: 3, kind: output, shape index: {1}]  }
   0x1   :  { %10 = vsyncpa [#allocation6], 0 }
   0x2   :  { %11 = vsyncpa [#allocation4], 0 }
   0x3   :  { %12 = vsyncpa [#allocation9], 0  ;;  %s275_s12 = smov [#allocation2]  }
   0x4   :  { %s23_s13 = sshll.u32 %s275_s12, 4  ;;  %s24_s13 = int_to_ptr.vmem [resolvable:$true] %s23_s13 }
   0x5   :  { %s195_s14 = scalar_lea.vmem %s24_s13, 256  ;;  %p200_p1 = scmp.lt.s32.totalorder %s24_s13, %s24_s13 }
   0x6   :  { %p196_p0 = scmp.ne.s32.totalorder %s24_s13, %s195_s14  ;;  %p201_p2 = scmp.lt.s32.totalorder %s195_s14, %s195_s14 }
   0x8   :  { %p202_p3 = por %p201_p2, %p200_p1 }
   0xa   :  { %p203_p4 = pnand %p202_p3, %p196_p0 }
   0xc   :  { %206 = shalt.err (!%p203_p4)
}
   0xd   :  { %s276_s15 = smov 128   ;;  %s277_s16 = smov 8  }
   0xe   :  { %29 = dma.hbm_to_vmem [thread:$0]  %s314_s0, 256, %s24_s13, [#allocation3], %s276_s15, %s276_s15, %s277_s16  }
   0xf   :  { %s278_s19 = smov [#allocation5]  }
  0x10   :  { %s40_s20 = sshll.u32 %s278_s19, 4  ;;  %s41_s20 = int_to_ptr.vmem [resolvable:$true] %s40_s20 }
  0x11   :  { %s215_s21 = scalar_lea.vmem %s41_s20, 256  ;;  %p220_p6 = scmp.lt.s32.totalorder %s41_s20, %s41_s20 }
  0x12   :  { %p216_p5 = scmp.ne.s32.totalorder %s41_s20, %s215_s21  ;;  %p221_p7 = scmp.lt.s32.totalorder %s215_s21, %s215_s21 }
  0x14   :  { %p222_p8 = por %p221_p7, %p220_p6 }
  0x16   :  { %p223_p9 = pnand %p222_p8, %p216_p5 }
  0x18   :  { %226 = shalt.err (!%p223_p9)
}
  0x19   :  { %46 = dma.hbm_to_vmem [thread:$0]  %s315_s1, 256, %s41_s20, [#allocation6], %s276_s15, %s276_s15, %s277_s16  }
  0x1a   :  { %267 = dma.done.wait [#allocation3], 256  }
  0x1b   :  { %268 = vsyncadd [#allocation3], 4294967040 }
  0x1c   :  { %269 = dma.done.wait [#allocation6], 256  }
  0x1d   :  { %270 = vsyncadd [#allocation6], 4294967040  ;;  %v279_v0 = vmov 0.0   ;;  %v65_v1 = vld [vmem:[#allocation2] sm:$0xff]  ;;  %v66_v2 = vld [vmem:[#allocation2 + $0x8] sm:$0xff]  ;;  %vm124_vm0 = vcmask 1041409  }
  0x1e   :  { %63 = vst [vmem:[#allocation7] sm:$0x3] %v279_v0  ;;  %64 = vst [vmem:[#allocation8] sm:$0x3] %v279_v0  ;;  %v170_v3 = vmul.f32 -1.442695, %v65_v1 }
  0x1f   :  { %v171_v4 = vmul.f32 -1.442695, %v66_v2  ;;  %v79_v9 = vld [vmem:[#allocation5] sm:$0xff]  ;;  %v80_v10 = vld [vmem:[#allocation5 + $0x8] sm:$0xff]  ;;  %s280_s0 = smov [#allocation7]   ;;  %s281_s24 = smov [#allocation8]  }
  0x20   :  { %179 = vpow2.f32 %v170_v3  ;;  %v107_v11 = vrot.slane %v79_v9, 4  ;;  %v113_v12 = vrot.slane %v80_v10, 4  ;;  %s142_s1 = sshll.u32 %s280_s0, 4  ;;  %s152_s25 = sshll.u32 %s281_s24, 4  ;;  %s143_s1 = int_to_ptr.vmem [resolvable:$true] %s142_s1  ;;  %s153_s25 = int_to_ptr.vmem [resolvable:$true] %s152_s25 }
  0x21   :  { %181 = vpow2.f32 %v171_v4  ;;  %s227_s26 = scalar_lea.vmem %s143_s1, 32  ;;  %p232_p11 = scmp.lt.s32.totalorder %s143_s1, %s143_s1 }
  0x22   :  { %v108_v13 = vadd.f32 %v107_v11, %v79_v9  ;;  %v114_v14 = vadd.f32 %v113_v12, %v80_v10  ;;  %p228_p10 = scmp.ne.s32.totalorder %s143_s1, %s227_s26  ;;  %p233_p12 = scmp.lt.s32.totalorder %s227_s26, %s227_s26 }
  0x24   :  { %v109_v15 = vrot.slane %v108_v13, 2  ;;  %v115_v16 = vrot.slane %v114_v14, 2  ;;  %p234_p13 = por %p233_p12, %p232_p11 }
  0x25   :  { %v121_v52 = vld [vmem:[#allocation7] sm:$0x3]  ;;  %v129_v54 = vld [vmem:[#allocation8] sm:$0x3] }
  0x26   :  { %v110_v21 = vadd.f32 %v109_v15, %v108_v13  ;;  %v116_v24 = vadd.f32 %v115_v16, %v114_v14  ;;  %p235_p0 = pnand %p234_p13, %p228_p10 }
  0x28   :  { %v111_v31 = vrot.slane %v110_v21, 1  ;;  %v117_v34 = vrot.slane %v116_v24, 1 }
  0x2a   :  { %v112_v41 = vadd.f32 %v111_v31, %v110_v21  ;;  %v118_v44 = vadd.f32 %v117_v34, %v116_v24 }
  0x2d   :  { %v180_v5 = vpop.eup %179 }
  0x2e   :  { %v182_v6 = vpop.eup %181  ;;  %v73_v7 = vadd.f32 1.0, %v180_v5 }
  0x2f   :  { %v74_v8 = vadd.f32 1.0, %v182_v6 }
  0x30   :  { %183 = vrcp.f32 %v73_v7 }
  0x31   :  { %185 = vrcp.f32 %v74_v8 }
  0x3d   :  { %v184_v17 = vpop.eup %183 }
  0x3e   :  { %v186_v18 = vpop.eup %185  ;;  %v81_v19 = vmul.f32 %v184_v17, %v79_v9  ;;  %v95_v20 = vrot.slane %v184_v17, 4 }
  0x3f   :  { %v82_v22 = vmul.f32 %v186_v18, %v80_v10  ;;  %v101_v23 = vrot.slane %v186_v18, 4 }
  0x40   :  { %v83_v25 = vrot.slane %v81_v19, 4  ;;  %v96_v26 = vadd.f32 %v184_v17, %v95_v20 }
  0x41   :  { %v89_v27 = vrot.slane %v82_v22, 4  ;;  %v102_v28 = vadd.f32 %v186_v18, %v101_v23 }
  0x42   :  { %v84_v29 = vadd.f32 %v83_v25, %v81_v19  ;;  %v97_v30 = vrot.slane %v96_v26, 2 }
  0x43   :  { %v90_v32 = vadd.f32 %v89_v27, %v82_v22  ;;  %v103_v33 = vrot.slane %v102_v28, 2 }
  0x44   :  { %v85_v35 = vrot.slane %v84_v29, 2  ;;  %v98_v36 = vadd.f32 %v97_v30, %v96_v26 }
  0x45   :  { %v91_v37 = vrot.slane %v90_v32, 2  ;;  %v104_v38 = vadd.f32 %v103_v33, %v102_v28 }
  0x46   :  { %v86_v39 = vadd.f32 %v85_v35, %v84_v29  ;;  %v99_v40 = vrot.slane %v98_v36, 1 }
  0x47   :  { %v92_v42 = vadd.f32 %v91_v37, %v90_v32  ;;  %v105_v43 = vrot.slane %v104_v38, 1 }
  0x48   :  { %v87_v45 = vrot.slane %v86_v39, 1  ;;  %v100_v46 = vadd.f32 %v99_v40, %v98_v36 }
  0x49   :  { %v93_v47 = vrot.slane %v92_v42, 1  ;;  %v106_v48 = vadd.f32 %v105_v43, %v104_v38 }
  0x4a   :  { %v88_v49 = vadd.f32 %v87_v45, %v86_v39  ;;  %v119_v50 = vadd.f32 %v112_v41, %v100_v46 }
  0x4b   :  { %v94_v51 = vadd.f32 %v93_v47, %v92_v42  ;;  %v120_v53 = vadd.f32 %v118_v44, %v106_v48 }
  0x4d   :  { %v125_v55 = vsel %vm124_vm0, %v94_v51, %v88_v49  ;;  %v132_v56 = vsel %vm124_vm0, %v120_v53, %v119_v50 }
  0x4e   :  { %v127_v57 = vadd.f32 %v125_v55, %v121_v52  ;;  %v134_v58 = vadd.f32 %v132_v56, %v129_v54 }
  0x50   :  { %128 = vst [vmem:[#allocation7] sm:$0x3] %v127_v57  ;;  %135 = vst [vmem:[#allocation8] sm:$0x3] %v134_v58 }
  0x51   :  { %238 = shalt.err (!%p235_p0)
}
  0x52   :  { %145 = dma.vmem_to_hbm [thread:$0]  %s143_s1, 32, %s316_s2, [#allocation4]  }
  0x53   :  { %s247_s29 = scalar_lea.vmem %s153_s25, 32  ;;  %p252_p2 = scmp.lt.s32.totalorder %s153_s25, %s153_s25 }
  0x54   :  { %p248_p1 = scmp.ne.s32.totalorder %s153_s25, %s247_s29  ;;  %p253_p3 = scmp.lt.s32.totalorder %s247_s29, %s247_s29 }
  0x56   :  { %p254_p4 = por %p253_p3, %p252_p2 }
  0x58   :  { %p255_p5 = pnand %p254_p4, %p248_p1 }
  0x5a   :  { %258 = shalt.err (!%p255_p5)
}
  0x5b   :  { %155 = dma.vmem_to_hbm [thread:$0]  %s153_s25, 32, %s317_s3, [#allocation9]  }
  0x5c   :  { %271 = dma.done.wait [#allocation4], 32  }
  0x5d   :  { %272 = vsyncadd [#allocation4], 4294967264 }
  0x5e   :  { %273 = dma.done.wait [#allocation9], 32  }
  0x5f   :  { %274 = vsyncadd [#allocation9], 4294967264 }
  0x60   :  { %162 = vsyncpa [#allocation3], 1 }
  0x61   :  { %163 = vsyncpa [#allocation6], 1 }
  0x62   :  { %164 = vsyncpa [#allocation4], 1 }
  0x63   :  { %165 = vsyncpa [#allocation9], 1 }

</bundles_post_ra>
